<compile_context>
chip_gen: v6e
topology: v6e:2x2x1
jax: 0.10.0
libtpu: 0.0.40
codegen_flags: <defaults>
</compile_context>

<pallas_src>
import jax
import jax.numpy as jnp
import numpy as np
from jax.experimental import pallas as pl
from jax.experimental.pallas import tpu as pltpu

# ---- problem sizes (small, consistent with the module) ----
BATCH = 2
SEQ = 8
IN_FEATURES = 32
OUT_FEATURES = 16
HIDDEN_EXPANSION = 0.125
HIDDEN = int(HIDDEN_EXPANSION * IN_FEATURES)   # = 4
HP = HIDDEN + 1                                 # augmented with the b2 row
N_PAIRS = HP * (HP + 1) // 2                    # 15 upper-triangular Gram rows
EPS = 1e-5
MAX_TM = 512                                    # token-tile cap for VMEM headroom


def meta_linear2_kernel(x_ref, w_all_ref, b_all_ref, m2_ref, g_ref,
                        w4_ref, b4_ref, y_ref):
    OUT = OUT_FEATURES

    x = x_ref[...].astype(jnp.float32)                      # (TM, IN)
    tm = x.shape[0]
    sx = jnp.sum(x, axis=-1, keepdims=True)                 # (TM, 1)

    # Single MXU matmul (K = IN = 32).  Lane layout of the result:
    #   z[:, :HP*OUT]                 c   : x-contraction of augmented W2||b2
    #   z[:, HP*OUT : HP*OUT+H]       h_w : weight hyper-net hidden activations
    #   z[:, HP*OUT+H : HP*OUT+2H]    h_b : bias   hyper-net hidden activations
    z = jnp.dot(x, w_all_ref[...],
                preferred_element_type=jnp.float32) + b_all_ref[...]
    c = z[:, :HP * OUT]                                     # (TM, HP*OUT)
    hw_cols = [z[:, HP * OUT + h: HP * OUT + h + 1] for h in range(HIDDEN)]
    hb_cols = [z[:, HP * OUT + HIDDEN + h: HP * OUT + HIDDEN + h + 1]
               for h in range(HIDDEN)]

    m2 = m2_ref[...]        # (HP, OUT)       mean_i W2aug[h', o*IN + i]
    w4 = w4_ref[...]        # (H, OUT)

    # ---- weight branch, layernorm folded into the per-token bmm ----
    # dot / mu are linear in the augmented coefficients [h_w, 1]:
    dot_w = c[:, HIDDEN * OUT:HP * OUT]                     # "* 1" (b2-row) term
    mu_w = jnp.zeros((tm, OUT), jnp.float32) + m2[HIDDEN:HP, :]
    for h in range(HIDDEN):                                 # unrolled VPU FMAs
        dot_w = dot_w + hw_cols[h] * c[:, h * OUT:(h + 1) * OUT]
        mu_w = mu_w + hw_cols[h] * m2[h:h + 1, :]

    # E[W^2] = coeff^T Gram coeff; Gram upper triangle, off-diag pre-scaled x2.
    ew2 = jnp.zeros((tm, OUT), jnp.float32)
    row = 0
    for h1 in range(HP):
        for h2 in range(h1, HP):
            grow = g_ref[row:row + 1, :]                    # (1, OUT)
            if h1 == HIDDEN:                                # 1 * 1 term
                ew2 = ew2 + grow
            elif h2 == HIDDEN:                              # coeff * 1 term
                ew2 = ew2 + hw_cols[h1] * grow
            else:
                ew2 = ew2 + (hw_cols[h1] * hw_cols[h2]) * grow
            row += 1

    var_w = ew2 - mu_w * mu_w                               # biased var over IN
    y_w = (dot_w - mu_w * sx) * jax.lax.rsqrt(var_w + EPS)  # (TM, OUT)

    # ---- bias branch: b_gen = h_b @ W4 + b4 (K=4 kept off the MXU) ----
    b_gen = jnp.zeros((tm, OUT), jnp.float32) + b4_ref[...]
    for h in range(HIDDEN):
        b_gen = b_gen + hb_cols[h] * w4[h:h + 1, :]

    # layer_norm over OUT (no affine, biased variance)
    mu_b = jnp.mean(b_gen, axis=-1, keepdims=True)
    var_b = jnp.mean((b_gen - mu_b) ** 2, axis=-1, keepdims=True)
    bn = (b_gen - mu_b) * jax.lax.rsqrt(var_b + EPS)        # (TM, OUT)

    y_ref[...] = (y_w + bn).astype(y_ref.dtype)


def _derive_hyper_weights(p):
    """Wrapper-side (pure JAX) weight reshuffles / reductions.

    W2aug = [W2; b2] with flat column index o*IN + i (matches reshape (OUT, IN)).
      w2r[i, h'*OUT + o] = W2aug[h', o*IN + i]        -> contract IN on the MXU
      m2[h', o]          = mean_i W2aug[h', o*IN + i]
      g_ut[row, o]       = gram[h1, h2, o] (upper tri, off-diagonal pre-x2)
      w_all / b_all      = fused [W2r | W1 | W3] projection and its bias row.
    """
    w2aug = jnp.concatenate([p["w2"], p["b2"]], axis=0)              # (HP, IN*OUT)
    w2aug3 = w2aug.reshape(HP, OUT_FEATURES, IN_FEATURES)            # (HP, OUT, IN)
    m2 = jnp.mean(w2aug3, axis=-1)                                   # (HP, OUT)
    gram = jnp.einsum("aoi,boi->abo", w2aug3, w2aug3) / IN_FEATURES  # (HP,HP,OUT)
    rows = []
    for h1 in range(HP):
        for h2 in range(h1, HP):
            r = gram[h1, h2]
            rows.append(r if h1 == h2 else 2.0 * r)
    g_ut = jnp.stack(rows, axis=0)                                   # (N_PAIRS, OUT)

    w2r = jnp.transpose(w2aug3, (2, 0, 1)).reshape(IN_FEATURES, HP * OUT_FEATURES)
    w_all = jnp.concatenate([w2r, p["w1"], p["w3"]], axis=1)         # (IN, HP*OUT+2H)
    b_all = jnp.concatenate(
        [jnp.zeros((1, HP * OUT_FEATURES), jnp.float32), p["b1"], p["b3"]], axis=1)
    return w_all, b_all, m2, g_ut


def meta_linear2(x, params):
    B, S, E = x.shape
    assert E == IN_FEATURES
    n_tok = B * S
    # One grid step covers as many tokens as possible (per-step overhead ~0.35us);
    # capped so per-step VMEM stays modest at large token counts, where the
    # "parallel" grid also shards across both v7x TensorCores.
    tm = n_tok if n_tok <= MAX_TM else MAX_TM
    assert tm % 8 == 0 and n_tok % tm == 0
    x2d = x.reshape(n_tok, E)

    w_all, b_all, m2, g_ut = _derive_hyper_weights(params)

    def full(a):
        return pl.BlockSpec(a.shape, lambda i: (0, 0))

    out = pl.pallas_call(
        meta_linear2_kernel,
        out_shape=jax.ShapeDtypeStruct((n_tok, OUT_FEATURES), x.dtype),
        grid_spec=pltpu.PrefetchScalarGridSpec(
            num_scalar_prefetch=0,
            grid=(n_tok // tm,),
            in_specs=[
                pl.BlockSpec((tm, IN_FEATURES), lambda i: (i, 0)),
                full(w_all), full(b_all), full(m2), full(g_ut),
                full(params["w4"]), full(params["b4"]),
            ],
            out_specs=pl.BlockSpec((tm, OUT_FEATURES), lambda i: (i, 0)),
        ),
        compiler_params=pltpu.CompilerParams(
            dimension_semantics=("parallel",)),
    )(x2d, w_all, b_all, m2, g_ut, params["w4"], params["b4"])

    return out.reshape(B, S, OUT_FEATURES)


def init_params(key):
    """Deterministic init (weights stored as (in, out), i.e. torch W^T)."""
    ks = jax.random.split(key, 8)

    def uni(k, shape, fan_in):
        bound = 1.0 / np.sqrt(fan_in)
        return jax.random.uniform(k, shape, jnp.float32, -bound, bound)

    return {
        "w1": uni(ks[0], (IN_FEATURES, HIDDEN), IN_FEATURES),
        "b1": uni(ks[1], (1, HIDDEN), IN_FEATURES),
        "w2": uni(ks[2], (HIDDEN, IN_FEATURES * OUT_FEATURES), HIDDEN),
        "b2": uni(ks[3], (1, IN_FEATURES * OUT_FEATURES), HIDDEN),
        "w3": uni(ks[4], (IN_FEATURES, HIDDEN), IN_FEATURES),
        "b3": uni(ks[5], (1, HIDDEN), IN_FEATURES),
        "w4": uni(ks[6], (HIDDEN, OUT_FEATURES), HIDDEN),
        "b4": uni(ks[7], (1, OUT_FEATURES), HIDDEN),
    }


def meta_linear2_ref(x, p):
    """Pure-JAX reference mirroring the PyTorch forward pass."""
    B, S, E = x.shape
    xf = x.reshape(B * S, E)

    def ln(v):
        mu = jnp.mean(v, axis=-1, keepdims=True)
        var = jnp.mean((v - mu) ** 2, axis=-1, keepdims=True)
        return (v - mu) * jax.lax.rsqrt(var + EPS)

    w = (xf @ p["w1"] + p["b1"]) @ p["w2"] + p["b2"]
    W = ln(w.reshape(B * S, OUT_FEATURES, IN_FEATURES))
    b = ln((xf @ p["w3"] + p["b3"]) @ p["w4"] + p["b4"])
    y = jnp.einsum("noi,ni->no", W, xf) + b
    return y.reshape(B, S, OUT_FEATURES)


if __name__ == "__main__":
    key = jax.random.PRNGKey(0)
    k_x, k_p = jax.random.split(key)
    x = jax.random.normal(k_x, (BATCH, SEQ, IN_FEATURES), jnp.float32)
    params = init_params(k_p)

    y = meta_linear2(x, params)
    jax.block_until_ready(y)

    y_ref = meta_linear2_ref(x, params)
    # The layernorm-folded formulation changes summation order slightly
    # (expected ~1e-5 level differences), so keep a small absolute slack.
    np.testing.assert_allclose(np.asarray(y), np.asarray(y_ref),
                               rtol=1e-4, atol=2e-4)
    print("KERNEL_OK")
</pallas_src>

<mosaic_0001>
module attributes {stable_mosaic.version = 11 : i64} {
  func.func @meta_linear2_kernel(%arg0: i32, %arg1: memref<16x32xf32, #tpu.memory_space<vmem>>, %arg2: memref<32x88xf32, #tpu.memory_space<vmem>>, %arg3: memref<1x88xf32, #tpu.memory_space<vmem>>, %arg4: memref<5x16xf32, #tpu.memory_space<vmem>>, %arg5: memref<15x16xf32, #tpu.memory_space<vmem>>, %arg6: memref<4x16xf32, #tpu.memory_space<vmem>>, %arg7: memref<1x16xf32, #tpu.memory_space<vmem>>, %arg8: memref<16x16xf32, #tpu.memory_space<vmem>>) attributes {dimension_semantics = [#tpu.dimension_semantics<parallel>], iteration_bounds = array<i64: 1>, scalar_prefetch = 0 : i64, scratch_operands = 0 : i64, tpu.core_type = #tpu.core_type<tc>, window_params = [{transform_indices = @transform_0, window_bounds = array<i64: 16, 32>}, {pipeline_mode = #tpu.pipeline_mode<synchronous>, transform_indices = @transform_1, window_bounds = array<i64: 32, 88>}, {pipeline_mode = #tpu.pipeline_mode<synchronous>, transform_indices = @transform_2, window_bounds = array<i64: 1, 88>}, {pipeline_mode = #tpu.pipeline_mode<synchronous>, transform_indices = @transform_3, window_bounds = array<i64: 5, 16>}, {pipeline_mode = #tpu.pipeline_mode<synchronous>, transform_indices = @transform_4, window_bounds = array<i64: 15, 16>}, {pipeline_mode = #tpu.pipeline_mode<synchronous>, transform_indices = @transform_5, window_bounds = array<i64: 4, 16>}, {pipeline_mode = #tpu.pipeline_mode<synchronous>, transform_indices = @transform_6, window_bounds = array<i64: 1, 16>}, {transform_indices = @transform_7, window_bounds = array<i64: 16, 16>}]} {
    %c0 = arith.constant 0 : index
    %c0_0 = arith.constant 0 : index
    %0 = vector.load %arg1[%c0, %c0_0] : memref<16x32xf32, #tpu.memory_space<vmem>>, vector<16x32xf32>
    %cst = arith.constant dense<0.000000e+00> : vector<16xf32>
    %1 = vector.multi_reduction <add>, %0, %cst [1] : vector<16x32xf32> to vector<16xf32>
    %2 = vector.shape_cast %1 : vector<16xf32> to vector<16x1xf32>
    %c0_1 = arith.constant 0 : index
    %c0_2 = arith.constant 0 : index
    %3 = vector.load %arg2[%c0_1, %c0_2] : memref<32x88xf32, #tpu.memory_space<vmem>>, vector<32x88xf32>
    %cst_3 = arith.constant dense<0.000000e+00> : vector<16x88xf32>
    %4 = tpu.matmul %0, %3, %cst_3 {dimension_numbers = #tpu.dot_dimension_numbers<[1], [0], [0], [1], [0, 0, 1, 1], [], []>} : vector<16x32xf32>, vector<32x88xf32>, vector<16x88xf32> -> vector<16x88xf32>
    %c0_4 = arith.constant 0 : index
    %c0_5 = arith.constant 0 : index
    %5 = vector.load %arg3[%c0_4, %c0_5] : memref<1x88xf32, #tpu.memory_space<vmem>>, vector<1x88xf32>
    %6 = vector.broadcast %5 : vector<1x88xf32> to vector<16x88xf32>
    %7 = arith.addf %4, %6 : vector<16x88xf32>
    %8 = vector.extract_strided_slice %7 {offsets = [0, 0], sizes = [16, 80], strides = [1, 1]} : vector<16x88xf32> to vector<16x80xf32>
    %9 = vector.extract_strided_slice %7 {offsets = [0, 80], sizes = [16, 1], strides = [1, 1]} : vector<16x88xf32> to vector<16x1xf32>
    %10 = vector.extract_strided_slice %7 {offsets = [0, 81], sizes = [16, 1], strides = [1, 1]} : vector<16x88xf32> to vector<16x1xf32>
    %11 = vector.extract_strided_slice %7 {offsets = [0, 82], sizes = [16, 1], strides = [1, 1]} : vector<16x88xf32> to vector<16x1xf32>
    %12 = vector.extract_strided_slice %7 {offsets = [0, 83], sizes = [16, 1], strides = [1, 1]} : vector<16x88xf32> to vector<16x1xf32>
    %13 = vector.extract_strided_slice %7 {offsets = [0, 84], sizes = [16, 1], strides = [1, 1]} : vector<16x88xf32> to vector<16x1xf32>
    %14 = vector.extract_strided_slice %7 {offsets = [0, 85], sizes = [16, 1], strides = [1, 1]} : vector<16x88xf32> to vector<16x1xf32>
    %15 = vector.extract_strided_slice %7 {offsets = [0, 86], sizes = [16, 1], strides = [1, 1]} : vector<16x88xf32> to vector<16x1xf32>
    %16 = vector.extract_strided_slice %7 {offsets = [0, 87], sizes = [16, 1], strides = [1, 1]} : vector<16x88xf32> to vector<16x1xf32>
    %c0_6 = arith.constant 0 : index
    %c0_7 = arith.constant 0 : index
    %17 = vector.load %arg4[%c0_6, %c0_7] : memref<5x16xf32, #tpu.memory_space<vmem>>, vector<5x16xf32>
    %c0_8 = arith.constant 0 : index
    %c0_9 = arith.constant 0 : index
    %18 = vector.load %arg6[%c0_8, %c0_9] : memref<4x16xf32, #tpu.memory_space<vmem>>, vector<4x16xf32>
    %19 = vector.extract_strided_slice %8 {offsets = [0, 64], sizes = [16, 16], strides = [1, 1]} : vector<16x80xf32> to vector<16x16xf32>
    %cst_10 = arith.constant 0.000000e+00 : f32
    %20 = vector.broadcast %cst_10 : f32 to vector<16x16xf32>
    %21 = vector.extract_strided_slice %17 {offsets = [4, 0], sizes = [1, 16], strides = [1, 1]} : vector<5x16xf32> to vector<1x16xf32>
    %22 = vector.broadcast %21 : vector<1x16xf32> to vector<16x16xf32>
    %23 = arith.addf %20, %22 : vector<16x16xf32>
    %24 = vector.extract_strided_slice %8 {offsets = [0, 0], sizes = [16, 16], strides = [1, 1]} : vector<16x80xf32> to vector<16x16xf32>
    %25 = vector.broadcast %9 : vector<16x1xf32> to vector<16x16xf32>
    %26 = arith.mulf %25, %24 : vector<16x16xf32>
    %27 = arith.addf %19, %26 : vector<16x16xf32>
    %28 = vector.extract_strided_slice %17 {offsets = [0, 0], sizes = [1, 16], strides = [1, 1]} : vector<5x16xf32> to vector<1x16xf32>
    %29 = vector.broadcast %9 : vector<16x1xf32> to vector<16x16xf32>
    %30 = vector.broadcast %28 : vector<1x16xf32> to vector<16x16xf32>
    %31 = arith.mulf %29, %30 : vector<16x16xf32>
    %32 = arith.addf %23, %31 : vector<16x16xf32>
    %33 = vector.extract_strided_slice %8 {offsets = [0, 16], sizes = [16, 16], strides = [1, 1]} : vector<16x80xf32> to vector<16x16xf32>
    %34 = vector.broadcast %10 : vector<16x1xf32> to vector<16x16xf32>
    %35 = arith.mulf %34, %33 : vector<16x16xf32>
    %36 = arith.addf %27, %35 : vector<16x16xf32>
    %37 = vector.extract_strided_slice %17 {offsets = [1, 0], sizes = [1, 16], strides = [1, 1]} : vector<5x16xf32> to vector<1x16xf32>
    %38 = vector.broadcast %10 : vector<16x1xf32> to vector<16x16xf32>
    %39 = vector.broadcast %37 : vector<1x16xf32> to vector<16x16xf32>
    %40 = arith.mulf %38, %39 : vector<16x16xf32>
    %41 = arith.addf %32, %40 : vector<16x16xf32>
    %42 = vector.extract_strided_slice %8 {offsets = [0, 32], sizes = [16, 16], strides = [1, 1]} : vector<16x80xf32> to vector<16x16xf32>
    %43 = vector.broadcast %11 : vector<16x1xf32> to vector<16x16xf32>
    %44 = arith.mulf %43, %42 : vector<16x16xf32>
    %45 = arith.addf %36, %44 : vector<16x16xf32>
    %46 = vector.extract_strided_slice %17 {offsets = [2, 0], sizes = [1, 16], strides = [1, 1]} : vector<5x16xf32> to vector<1x16xf32>
    %47 = vector.broadcast %11 : vector<16x1xf32> to vector<16x16xf32>
    %48 = vector.broadcast %46 : vector<1x16xf32> to vector<16x16xf32>
    %49 = arith.mulf %47, %48 : vector<16x16xf32>
    %50 = arith.addf %41, %49 : vector<16x16xf32>
    %51 = vector.extract_strided_slice %8 {offsets = [0, 48], sizes = [16, 16], strides = [1, 1]} : vector<16x80xf32> to vector<16x16xf32>
    %52 = vector.broadcast %12 : vector<16x1xf32> to vector<16x16xf32>
    %53 = arith.mulf %52, %51 : vector<16x16xf32>
    %54 = arith.addf %45, %53 : vector<16x16xf32>
    %55 = vector.extract_strided_slice %17 {offsets = [3, 0], sizes = [1, 16], strides = [1, 1]} : vector<5x16xf32> to vector<1x16xf32>
    %56 = vector.broadcast %12 : vector<16x1xf32> to vector<16x16xf32>
    %57 = vector.broadcast %55 : vector<1x16xf32> to vector<16x16xf32>
    %58 = arith.mulf %56, %57 : vector<16x16xf32>
    %59 = arith.addf %50, %58 : vector<16x16xf32>
    %cst_11 = arith.constant 0.000000e+00 : f32
    %60 = vector.broadcast %cst_11 : f32 to vector<16x16xf32>
    %c0_12 = arith.constant 0 : index
    %c0_13 = arith.constant 0 : index
    %61 = vector.load %arg5[%c0_12, %c0_13] : memref<15x16xf32, #tpu.memory_space<vmem>>, vector<1x16xf32>
    %62 = arith.mulf %9, %9 : vector<16x1xf32>
    %63 = vector.broadcast %62 : vector<16x1xf32> to vector<16x16xf32>
    %64 = vector.broadcast %61 : vector<1x16xf32> to vector<16x16xf32>
    %65 = arith.mulf %63, %64 : vector<16x16xf32>
    %66 = arith.addf %60, %65 : vector<16x16xf32>
    %c1 = arith.constant 1 : index
    %c0_14 = arith.constant 0 : index
    %67 = vector.load %arg5[%c1, %c0_14] : memref<15x16xf32, #tpu.memory_space<vmem>>, vector<1x16xf32>
    %68 = arith.mulf %9, %10 : vector<16x1xf32>
    %69 = vector.broadcast %68 : vector<16x1xf32> to vector<16x16xf32>
    %70 = vector.broadcast %67 : vector<1x16xf32> to vector<16x16xf32>
    %71 = arith.mulf %69, %70 : vector<16x16xf32>
    %72 = arith.addf %66, %71 : vector<16x16xf32>
    %c2 = arith.constant 2 : index
    %c0_15 = arith.constant 0 : index
    %73 = vector.load %arg5[%c2, %c0_15] : memref<15x16xf32, #tpu.memory_space<vmem>>, vector<1x16xf32>
    %74 = arith.mulf %9, %11 : vector<16x1xf32>
    %75 = vector.broadcast %74 : vector<16x1xf32> to vector<16x16xf32>
    %76 = vector.broadcast %73 : vector<1x16xf32> to vector<16x16xf32>
    %77 = arith.mulf %75, %76 : vector<16x16xf32>
    %78 = arith.addf %72, %77 : vector<16x16xf32>
    %c3 = arith.constant 3 : index
    %c0_16 = arith.constant 0 : index
    %79 = vector.load %arg5[%c3, %c0_16] : memref<15x16xf32, #tpu.memory_space<vmem>>, vector<1x16xf32>
    %80 = arith.mulf %9, %12 : vector<16x1xf32>
    %81 = vector.broadcast %80 : vector<16x1xf32> to vector<16x16xf32>
    %82 = vector.broadcast %79 : vector<1x16xf32> to vector<16x16xf32>
    %83 = arith.mulf %81, %82 : vector<16x16xf32>
    %84 = arith.addf %78, %83 : vector<16x16xf32>
    %c4 = arith.constant 4 : index
    %c0_17 = arith.constant 0 : index
    %85 = vector.load %arg5[%c4, %c0_17] : memref<15x16xf32, #tpu.memory_space<vmem>>, vector<1x16xf32>
    %86 = vector.broadcast %9 : vector<16x1xf32> to vector<16x16xf32>
    %87 = vector.broadcast %85 : vector<1x16xf32> to vector<16x16xf32>
    %88 = arith.mulf %86, %87 : vector<16x16xf32>
    %89 = arith.addf %84, %88 : vector<16x16xf32>
    %c5 = arith.constant 5 : index
    %c0_18 = arith.constant 0 : index
    %90 = vector.load %arg5[%c5, %c0_18] : memref<15x16xf32, #tpu.memory_space<vmem>>, vector<1x16xf32>
    %91 = arith.mulf %10, %10 : vector<16x1xf32>
    %92 = vector.broadcast %91 : vector<16x1xf32> to vector<16x16xf32>
    %93 = vector.broadcast %90 : vector<1x16xf32> to vector<16x16xf32>
    %94 = arith.mulf %92, %93 : vector<16x16xf32>
    %95 = arith.addf %89, %94 : vector<16x16xf32>
    %c6 = arith.constant 6 : index
    %c0_19 = arith.constant 0 : index
    %96 = vector.load %arg5[%c6, %c0_19] : memref<15x16xf32, #tpu.memory_space<vmem>>, vector<1x16xf32>
    %97 = arith.mulf %10, %11 : vector<16x1xf32>
    %98 = vector.broadcast %97 : vector<16x1xf32> to vector<16x16xf32>
    %99 = vector.broadcast %96 : vector<1x16xf32> to vector<16x16xf32>
    %100 = arith.mulf %98, %99 : vector<16x16xf32>
    %101 = arith.addf %95, %100 : vector<16x16xf32>
    %c7 = arith.constant 7 : index
    %c0_20 = arith.constant 0 : index
    %102 = vector.load %arg5[%c7, %c0_20] : memref<15x16xf32, #tpu.memory_space<vmem>>, vector<1x16xf32>
    %103 = arith.mulf %10, %12 : vector<16x1xf32>
    %104 = vector.broadcast %103 : vector<16x1xf32> to vector<16x16xf32>
    %105 = vector.broadcast %102 : vector<1x16xf32> to vector<16x16xf32>
    %106 = arith.mulf %104, %105 : vector<16x16xf32>
    %107 = arith.addf %101, %106 : vector<16x16xf32>
    %c8 = arith.constant 8 : index
    %c0_21 = arith.constant 0 : index
    %108 = vector.load %arg5[%c8, %c0_21] : memref<15x16xf32, #tpu.memory_space<vmem>>, vector<1x16xf32>
    %109 = vector.broadcast %10 : vector<16x1xf32> to vector<16x16xf32>
    %110 = vector.broadcast %108 : vector<1x16xf32> to vector<16x16xf32>
    %111 = arith.mulf %109, %110 : vector<16x16xf32>
    %112 = arith.addf %107, %111 : vector<16x16xf32>
    %c9 = arith.constant 9 : index
    %c0_22 = arith.constant 0 : index
    %113 = vector.load %arg5[%c9, %c0_22] : memref<15x16xf32, #tpu.memory_space<vmem>>, vector<1x16xf32>
    %114 = arith.mulf %11, %11 : vector<16x1xf32>
    %115 = vector.broadcast %114 : vector<16x1xf32> to vector<16x16xf32>
    %116 = vector.broadcast %113 : vector<1x16xf32> to vector<16x16xf32>
    %117 = arith.mulf %115, %116 : vector<16x16xf32>
    %118 = arith.addf %112, %117 : vector<16x16xf32>
    %c10 = arith.constant 10 : index
    %c0_23 = arith.constant 0 : index
    %119 = vector.load %arg5[%c10, %c0_23] : memref<15x16xf32, #tpu.memory_space<vmem>>, vector<1x16xf32>
    %120 = arith.mulf %11, %12 : vector<16x1xf32>
    %121 = vector.broadcast %120 : vector<16x1xf32> to vector<16x16xf32>
    %122 = vector.broadcast %119 : vector<1x16xf32> to vector<16x16xf32>
    %123 = arith.mulf %121, %122 : vector<16x16xf32>
    %124 = arith.addf %118, %123 : vector<16x16xf32>
    %c11 = arith.constant 11 : index
    %c0_24 = arith.constant 0 : index
    %125 = vector.load %arg5[%c11, %c0_24] : memref<15x16xf32, #tpu.memory_space<vmem>>, vector<1x16xf32>
    %126 = vector.broadcast %11 : vector<16x1xf32> to vector<16x16xf32>
    %127 = vector.broadcast %125 : vector<1x16xf32> to vector<16x16xf32>
    %128 = arith.mulf %126, %127 : vector<16x16xf32>
    %129 = arith.addf %124, %128 : vector<16x16xf32>
    %c12 = arith.constant 12 : index
    %c0_25 = arith.constant 0 : index
    %130 = vector.load %arg5[%c12, %c0_25] : memref<15x16xf32, #tpu.memory_space<vmem>>, vector<1x16xf32>
    %131 = arith.mulf %12, %12 : vector<16x1xf32>
    %132 = vector.broadcast %131 : vector<16x1xf32> to vector<16x16xf32>
    %133 = vector.broadcast %130 : vector<1x16xf32> to vector<16x16xf32>
    %134 = arith.mulf %132, %133 : vector<16x16xf32>
    %135 = arith.addf %129, %134 : vector<16x16xf32>
    %c13 = arith.constant 13 : index
    %c0_26 = arith.constant 0 : index
    %136 = vector.load %arg5[%c13, %c0_26] : memref<15x16xf32, #tpu.memory_space<vmem>>, vector<1x16xf32>
    %137 = vector.broadcast %12 : vector<16x1xf32> to vector<16x16xf32>
    %138 = vector.broadcast %136 : vector<1x16xf32> to vector<16x16xf32>
    %139 = arith.mulf %137, %138 : vector<16x16xf32>
    %140 = arith.addf %135, %139 : vector<16x16xf32>
    %c14 = arith.constant 14 : index
    %c0_27 = arith.constant 0 : index
    %141 = vector.load %arg5[%c14, %c0_27] : memref<15x16xf32, #tpu.memory_space<vmem>>, vector<1x16xf32>
    %142 = vector.broadcast %141 : vector<1x16xf32> to vector<16x16xf32>
    %143 = arith.addf %140, %142 : vector<16x16xf32>
    %144 = arith.mulf %59, %59 : vector<16x16xf32>
    %145 = arith.subf %143, %144 : vector<16x16xf32>
    %146 = vector.broadcast %2 : vector<16x1xf32> to vector<16x16xf32>
    %147 = arith.mulf %59, %146 : vector<16x16xf32>
    %148 = arith.subf %54, %147 : vector<16x16xf32>
    %cst_28 = arith.constant 9.99999974E-6 : f32
    %149 = vector.broadcast %cst_28 : f32 to vector<16x16xf32>
    %150 = arith.addf %145, %149 : vector<16x16xf32>
    %151 = math.rsqrt %150 : vector<16x16xf32>
    %152 = arith.mulf %148, %151 : vector<16x16xf32>
    %cst_29 = arith.constant 0.000000e+00 : f32
    %153 = vector.broadcast %cst_29 : f32 to vector<16x16xf32>
    %c0_30 = arith.constant 0 : index
    %c0_31 = arith.constant 0 : index
    %154 = vector.load %arg7[%c0_30, %c0_31] : memref<1x16xf32, #tpu.memory_space<vmem>>, vector<1x16xf32>
    %155 = vector.broadcast %154 : vector<1x16xf32> to vector<16x16xf32>
    %156 = arith.addf %153, %155 : vector<16x16xf32>
    %157 = vector.extract_strided_slice %18 {offsets = [0, 0], sizes = [1, 16], strides = [1, 1]} : vector<4x16xf32> to vector<1x16xf32>
    %158 = vector.broadcast %13 : vector<16x1xf32> to vector<16x16xf32>
    %159 = vector.broadcast %157 : vector<1x16xf32> to vector<16x16xf32>
    %160 = arith.mulf %158, %159 : vector<16x16xf32>
    %161 = arith.addf %156, %160 : vector<16x16xf32>
    %162 = vector.extract_strided_slice %18 {offsets = [1, 0], sizes = [1, 16], strides = [1, 1]} : vector<4x16xf32> to vector<1x16xf32>
    %163 = vector.broadcast %14 : vector<16x1xf32> to vector<16x16xf32>
    %164 = vector.broadcast %162 : vector<1x16xf32> to vector<16x16xf32>
    %165 = arith.mulf %163, %164 : vector<16x16xf32>
    %166 = arith.addf %161, %165 : vector<16x16xf32>
    %167 = vector.extract_strided_slice %18 {offsets = [2, 0], sizes = [1, 16], strides = [1, 1]} : vector<4x16xf32> to vector<1x16xf32>
    %168 = vector.broadcast %15 : vector<16x1xf32> to vector<16x16xf32>
    %169 = vector.broadcast %167 : vector<1x16xf32> to vector<16x16xf32>
    %170 = arith.mulf %168, %169 : vector<16x16xf32>
    %171 = arith.addf %166, %170 : vector<16x16xf32>
    %172 = vector.extract_strided_slice %18 {offsets = [3, 0], sizes = [1, 16], strides = [1, 1]} : vector<4x16xf32> to vector<1x16xf32>
    %173 = vector.broadcast %16 : vector<16x1xf32> to vector<16x16xf32>
    %174 = vector.broadcast %172 : vector<1x16xf32> to vector<16x16xf32>
    %175 = arith.mulf %173, %174 : vector<16x16xf32>
    %176 = arith.addf %171, %175 : vector<16x16xf32>
    %cst_32 = arith.constant dense<0.000000e+00> : vector<16xf32>
    %177 = vector.multi_reduction <add>, %176, %cst_32 [1] : vector<16x16xf32> to vector<16xf32>
    %178 = vector.shape_cast %177 : vector<16xf32> to vector<16x1xf32>
    %cst_33 = arith.constant 1.600000e+01 : f32
    %179 = vector.broadcast %cst_33 : f32 to vector<16x1xf32>
    %180 = arith.divf %178, %179 : vector<16x1xf32>
    %181 = vector.broadcast %180 : vector<16x1xf32> to vector<16x16xf32>
    %182 = arith.subf %176, %181 : vector<16x16xf32>
    %183 = arith.mulf %182, %182 : vector<16x16xf32>
    %cst_34 = arith.constant dense<0.000000e+00> : vector<16xf32>
    %184 = vector.multi_reduction <add>, %183, %cst_34 [1] : vector<16x16xf32> to vector<16xf32>
    %185 = vector.shape_cast %184 : vector<16xf32> to vector<16x1xf32>
    %cst_35 = arith.constant 1.600000e+01 : f32
    %186 = vector.broadcast %cst_35 : f32 to vector<16x1xf32>
    %187 = arith.divf %185, %186 : vector<16x1xf32>
    %188 = vector.broadcast %180 : vector<16x1xf32> to vector<16x16xf32>
    %189 = arith.subf %176, %188 : vector<16x16xf32>
    %cst_36 = arith.constant 9.99999974E-6 : f32
    %190 = vector.broadcast %cst_36 : f32 to vector<16x1xf32>
    %191 = arith.addf %187, %190 : vector<16x1xf32>
    %192 = math.rsqrt %191 : vector<16x1xf32>
    %193 = vector.broadcast %192 : vector<16x1xf32> to vector<16x16xf32>
    %194 = arith.mulf %189, %193 : vector<16x16xf32>
    %195 = arith.addf %152, %194 : vector<16x16xf32>
    %c0_37 = arith.constant 0 : index
    %c0_38 = arith.constant 0 : index
    %196 = vector.load %arg8[%c0_37, %c0_38] : memref<16x16xf32, #tpu.memory_space<vmem>>, vector<16x16xf32>
    tpu.vector_store %arg8[%c0_37, %c0_38], %195 {strides = array<i32>} : memref<16x16xf32, #tpu.memory_space<vmem>>, vector<16x16xf32>,
    return
  }
  func.func @transform_0(%arg0: i32) -> (i32, i32) {
    %c0_i32 = arith.constant 0 : i32
    %c0_i32_0 = arith.constant 0 : i32
    return %arg0, %c0_i32 : i32, i32
  }
  func.func @transform_1(%arg0: i32) -> (i32, i32) {
    %c0_i32 = arith.constant 0 : i32
    %c0_i32_0 = arith.constant 0 : i32
    %c0_i32_1 = arith.constant 0 : i32
    return %c0_i32, %c0_i32_0 : i32, i32
  }
  func.func @transform_2(%arg0: i32) -> (i32, i32) {
    %c0_i32 = arith.constant 0 : i32
    %c0_i32_0 = arith.constant 0 : i32
    %c0_i32_1 = arith.constant 0 : i32
    return %c0_i32, %c0_i32_0 : i32, i32
  }
  func.func @transform_3(%arg0: i32) -> (i32, i32) {
    %c0_i32 = arith.constant 0 : i32
    %c0_i32_0 = arith.constant 0 : i32
    %c0_i32_1 = arith.constant 0 : i32
    return %c0_i32, %c0_i32_0 : i32, i32
  }
  func.func @transform_4(%arg0: i32) -> (i32, i32) {
    %c0_i32 = arith.constant 0 : i32
    %c0_i32_0 = arith.constant 0 : i32
    %c0_i32_1 = arith.constant 0 : i32
    return %c0_i32, %c0_i32_0 : i32, i32
  }
  func.func @transform_5(%arg0: i32) -> (i32, i32) {
    %c0_i32 = arith.constant 0 : i32
    %c0_i32_0 = arith.constant 0 : i32
    %c0_i32_1 = arith.constant 0 : i32
    return %c0_i32, %c0_i32_0 : i32, i32
  }
  func.func @transform_6(%arg0: i32) -> (i32, i32) {
    %c0_i32 = arith.constant 0 : i32
    %c0_i32_0 = arith.constant 0 : i32
    %c0_i32_1 = arith.constant 0 : i32
    return %c0_i32, %c0_i32_0 : i32, i32
  }
  func.func @transform_7(%arg0: i32) -> (i32, i32) {
    %c0_i32 = arith.constant 0 : i32
    %c0_i32_0 = arith.constant 0 : i32
    return %arg0, %c0_i32 : i32, i32
  }
}

</mosaic_0001>

<bundles_post_ra>
// kernel: tpu_custom_call.1
= control target key start
LH: loop header
LB: loop body
LE: loop exit
PB: predicated region body
PF: predicated region fallthrough
CT: control target
= control target key end

     0   :  { %12 = vsyncpa [#allocation3], 0  ;;  %s1203_s0 = inlined_call_operand.hbm [shape: f32[16,32], index: 0, kind: input, shape index: {}]   ;;  %s1204_s1 = inlined_call_operand.hbm [shape: f32[32,88], index: 1, kind: input, shape index: {}]   ;;  %s1205_s2 = inlined_call_operand.vmem [shape: f32[1,88], index: 2, kind: input, shape index: {}]   ;;  %s1206_s3 = inlined_call_operand.hbm [shape: f32[5,16], index: 3, kind: input, shape index: {}]   ;;  %s1207_s4 = inlined_call_operand.hbm [shape: f32[15,16], index: 4, kind: input, shape index: {}]   ;;  %s1208_s5 = inlined_call_operand.vmem [shape: f32[4,16], index: 5, kind: input, shape index: {}]   ;;  %s1209_s6 = inlined_call_operand.vmem [shape: f32[1,16], index: 6, kind: input, shape index: {}]   ;;  %s1210_s7 = inlined_call_operand.hbm [shape: f32[16,16], index: 7, kind: output, shape index: {}]  }
   0x1   :  { %13 = vsyncpa [#allocation6], 0 }
   0x2   :  { %14 = vsyncpa [#allocation9], 0 }
   0x3   :  { %15 = vsyncpa [#allocation4], 0  ;;  %s918_s24 = smov [#allocation5]   ;;  %s919_s26 = smov [#allocation2]  }
   0x4   :  { %s33_s25 = sshll.u32 %s918_s24, 4  ;;  %s21_s27 = sshll.u32 %s919_s26, 4  ;;  %s34_s25 = int_to_ptr.vmem [resolvable:$true] %s33_s25  ;;  %s22_s27 = int_to_ptr.vmem [resolvable:$true] %s21_s27 }
   0x5   :  { %s818_s28 = scalar_lea.vmem %s34_s25, 512  ;;  %p823_p1 = scmp.lt.s32.totalorder %s34_s25, %s34_s25 }
   0x6   :  { %p819_p0 = scmp.ne.s32.totalorder %s34_s25, %s818_s28  ;;  %p824_p2 = scmp.lt.s32.totalorder %s818_s28, %s818_s28 }
   0x8   :  { %p825_p3 = por %p824_p2, %p823_p1 }
   0xa   :  { %p826_p4 = pnand %p825_p3, %p819_p0 }
   0xc   :  { %829 = shalt.err (!%p826_p4)
}
   0xd   :  { %s920_s29 = smov 128   ;;  %s921_s30 = smov 8  }
   0xe   :  { %39 = dma.hbm_to_vmem [thread:$0]  %s1204_s1, 512, %s34_s25, [#allocation6], %s920_s29, %s920_s29, %s921_s30  }
   0xf   :  { %s838_s10 = scalar_lea.vmem %s22_s27, 256  ;;  %p843_p6 = scmp.lt.s32.totalorder %s22_s27, %s22_s27 }
  0x10   :  { %p839_p5 = scmp.ne.s32.totalorder %s22_s27, %s838_s10  ;;  %p844_p7 = scmp.lt.s32.totalorder %s838_s10, %s838_s10 }
  0x12   :  { %p845_p8 = por %p844_p7, %p843_p6 }
  0x14   :  { %p846_p9 = pnand %p845_p8, %p839_p5 }
  0x16   :  { %849 = shalt.err (!%p846_p9)
}
  0x17   :  { %27 = dma.hbm_to_vmem [thread:$0]  %s1203_s0, 256, %s22_s27, [#allocation3], %s920_s29, %s920_s29, %s921_s30  }
  0x18   :  { %s922_s13 = smov [#allocation7]   ;;  %s923_s15 = smov [#allocation8]  }
  0x19   :  { %s48_s14 = sshll.u32 %s922_s13, 4  ;;  %s57_s16 = sshll.u32 %s923_s15, 4  ;;  %s49_s14 = int_to_ptr.vmem [resolvable:$true] %s48_s14  ;;  %s58_s16 = int_to_ptr.vmem [resolvable:$true] %s57_s16 }
  0x1a   :  { %s858_s1 = scalar_lea.vmem %s49_s14, 128  ;;  %p863_p11 = scmp.lt.s32.totalorder %s49_s14, %s49_s14 }
  0x1b   :  { %p859_p10 = scmp.ne.s32.totalorder %s49_s14, %s858_s1  ;;  %p864_p12 = scmp.lt.s32.totalorder %s858_s1, %s858_s1 }
  0x1d   :  { %p865_p13 = por %p864_p12, %p863_p11 }
  0x1f   :  { %p866_p0 = pnand %p865_p13, %p859_p10 }
  0x21   :  { %869 = shalt.err (!%p866_p0)
}
  0x22   :  { %51 = dma.hbm_to_vmem [thread:$0]  %s1206_s3, 128, %s49_s14, [#allocation6]  }
  0x23   :  { %s878_s19 = scalar_lea.vmem %s58_s16, 256  ;;  %p883_p2 = scmp.lt.s32.totalorder %s58_s16, %s58_s16 }
  0x24   :  { %p879_p1 = scmp.ne.s32.totalorder %s58_s16, %s878_s19  ;;  %p884_p3 = scmp.lt.s32.totalorder %s878_s19, %s878_s19 }
  0x26   :  { %p885_p4 = por %p884_p3, %p883_p2 }
  0x28   :  { %p886_p5 = pnand %p885_p4, %p879_p1 }
  0x2a   :  { %889 = shalt.err (!%p886_p5)
}
  0x2b   :  { %63 = dma.hbm_to_vmem [thread:$0]  %s1207_s4, 256, %s58_s16, [#allocation9], %s920_s29, %s920_s29, %s921_s30  }
  0x2c   :  { %910 = dma.done.wait [#allocation3], 256  }
  0x2d   :  { %911 = vsyncadd [#allocation3], 4294967040 }
  0x2e   :  { %912 = dma.done.wait [#allocation6], 640  }
  0x2f   :  { %913 = vsyncadd [#allocation6], 4294966656 }
  0x30   :  { %914 = dma.done.wait [#allocation9], 256  }
  0x31   :  { %915 = vsyncadd [#allocation9], 4294967040  ;;  %vm82_vm0 = vcmask 261120   ;;  %v92_v0 = vld [vmem:[#allocation5 + $0x18] sm:$0xff]  ;;  %v91_v1 = vld [vmem:[#allocation5 + $0x10] sm:$0xff]  ;;  %v924_v6 = vmov 85   ;;  %v183_v20 = vlaneseq }
  0x32   :  { %743 = vmatprep.subr.mxu0 %v92_v0  ;;  %v1001_v2 = vld [vmem:[#allocation2] sm:$0xff]  ;;  %v90_v3 = vld [vmem:[#allocation5 + $0x8] sm:$0xff]  ;;  %v89_v4 = vld [vmem:[#allocation5] sm:$0xff]  ;;  %777 = vset.pattern.permute.xlu1 %v924_v6  ;;  %v925_v7 = vmov 84   ;;  %v926_v11 = vmov 86   ;;  %v927_v12 = vmov 87  }
  0x33   :  { %744 = vmatpush3.msra.mxu0 %v92_v0  ;;  %751 = vmatprep.mubr.msk.f32.mxu0 %vm82_vm0, %v1001_v2  ;;  %v1005_v5 = vld [vmem:[#allocation2 + $0x8] sm:$0xff]  ;;  %v718_v8 = vld [vmem:[%s1205_s2] ss:$0 sm:$0xff]  ;;  %s928_s21 = smov 127   ;;  %v929_v13 = vmov 81   ;;  %v930_v15 = vmov 80  }
  0x34   :  { %745 = vmatprep.subr.mxu0 %v91_v1  ;;  %776 = vset.pattern.permute.xlu0 %v925_v7  ;;  %s931_s2 = smov 126   ;;  %s932_s22 = smov 125   ;;  %v933_v17 = vmov 82   ;;  %v1065_v21 = vshrl.u32 %v183_v20, 7  ;;  %v182_v23 = vld [vmem:[%s1208_s5] sm:$0xf] }
  0x35   :  { %746 = vmatpush3.msra.mxu0 %v91_v1  ;;  %v736_v29 = vld [vmem:[%s1209_s6] ss:$0 sm:$0xff]  ;;  %v1086_v51 = vld [vmem:[#allocation7] sm:$0x1f]  ;;  %v934_v58 = vmov 83   ;;  %vm651_vm1 = vcmask 130048  }
  0x36   :  { %747 = vmatprep.subr.mxu0 %v90_v3  ;;  %v212_v22 = vsub.s32 0, %v1065_v21  ;;  %v240_v24 = vsub.s32 1, %v1065_v21  ;;  %v268_v26 = vsub.s32 2, %v1065_v21  ;;  %v296_v31 = vsub.s32 3, %v1065_v21  ;;  %s935_s5 = smov 64   ;;  %s936_s6 = smov 48  }
  0x37   :  { %748 = vmatpush3.msra.mxu0 %v90_v3  ;;  %v185_v50 = vsub.s32 4, %v1065_v21  ;;  %s937_s27 = smov 32   ;;  %s938_s28 = smov 16  }
  0x38   :  { %749 = vmatprep.subr.mxu0 %v89_v4  ;;  %v598_v25 = vrot.slane %v182_v23, %v212_v22  ;;  %v614_v27 = vrot.slane %v182_v23, %v240_v24  ;;  %v630_v33 = vrot.slane %v182_v23, %v268_v26  ;;  %v646_v36 = vrot.slane %v182_v23, %v296_v31  ;;  %s939_s8 = smov [#allocation10]  }
  0x39   :  { %750 = vmatpush3.msra.mxu0 %v89_v4  ;;  %v213_v54 = vrot.slane %v1086_v51, %v212_v22  ;;  %v241_v55 = vrot.slane %v1086_v51, %v240_v24  ;;  %v186_v57 = vrot.slane %v1086_v51, %v185_v50  ;;  %v269_v61 = vrot.slane %v1086_v51, %v268_v26  ;;  %s704_s9 = sshll.u32 %s939_s8, 4  ;;  %s705_s9 = int_to_ptr.vmem [resolvable:$true] %s704_s9 }
  0x3a   :  { %752 = vmatmul.mubr.msk.f32.vlgmr.msra.gmra.mxu0 %vm82_vm0, %v1005_v5  ;;  %s890_s10 = scalar_lea.vmem %s705_s9, 256  ;;  %p895_p7 = scmp.lt.s32.totalorder %s705_s9, %s705_s9 }
  0x3b   :  { %p891_p6 = scmp.ne.s32.totalorder %s705_s9, %s890_s10  ;;  %p896_p8 = scmp.lt.s32.totalorder %s890_s10, %s890_s10 }
  0x3d   :  { %p897_p9 = por %p896_p8, %p895_p7 }
  0x3f   :  { %p898_p10 = pnand %p897_p9, %p891_p6 }
  0xfa   :  { %v753_v9 = vpop.f32.mrf.mxu0 }
  0xfb   :  { %v1012_v10 = vadd.f32 %v753_v9, %v718_v8 }
  0xfc   :  { %v172_v14 = vpop.f32.mrf.mxu0 }
  0xfd   :  { %608 = vperm.xlu1 %777, %v1012_v10   ;;  %592 = vperm.xlu0 %776, %v1012_v10   ;;  %v1024_v16 = vadd.f32 %v718_v8, %v172_v14  ;;  %v1041_v18 = vmul.f32 %v1012_v10, %v1012_v10 }
  0xff   :  { %v1053_v19 = vmul.f32 %v1024_v16, %v1024_v16 }
 0x101   :  { %778 = vset.pattern.permute.xlu1 %v926_v11  ;;  %779 = vset.pattern.permute.xlu0 %v927_v12 }
 0x102   :  { %624 = vperm.xlu1 %778, %v1012_v10   ;;  %640 = vperm.xlu0 %779, %v1012_v10  }
 0x106   :  { %326 = vrot.lane.b32.xlu1 %v1012_v10, %s928_s21  ;;  %781 = vset.pattern.permute.xlu0 %v929_v13 }
 0x107   :  { %223 = vperm.xlu0 %781, %v1012_v10   ;;  %780 = vset.pattern.permute.xlu1 %v930_v15 }
 0x10a   :  { %353 = vrot.lane.b32.xlu1 %v1012_v10, %s931_s2 }
 0x10b   :  { %783 = vset.pattern.permute.xlu0 %v925_v7 }
 0x10c   :  { %588 = vperm.xlu0 %783, %v1024_v16  }
 0x10e   :  { %380 = vrot.lane.b32.xlu1 %v1012_v10, %s932_s22 }
 0x110   :  { %785 = vset.pattern.permute.xlu0 %v926_v11 }
 0x111   :  { %620 = vperm.xlu0 %785, %v1024_v16  }
 0x112   :  { %195 = vperm.xlu1 %780, %v1012_v10  }
 0x115   :  { %351 = vrot.lane.b32.xlu0 %v1024_v16, %s931_s2 }
 0x116   :  { %782 = vset.pattern.permute.xlu1 %v933_v17  ;;  %788 = vset.pattern.permute.xlu0 %v930_v15 }
 0x117   :  { %251 = vperm.xlu1 %782, %v1012_v10  }
 0x119   :  { %378 = vrot.lane.b32.xlu0 %v1024_v16, %s932_s22 }
 0x11b   :  { %784 = vset.pattern.permute.xlu1 %v924_v6 }
 0x11c   :  { %604 = vperm.xlu1 %784, %v1024_v16  }
 0x11d   :  { %190 = vperm.xlu0 %788, %v1024_v16  }
 0x120   :  { %786 = vset.pattern.permute.xlu1 %v927_v12 }
 0x121   :  { %636 = vperm.xlu1 %786, %v1024_v16   ;;  %790 = vset.pattern.permute.xlu0 %v933_v17 }
 0x122   :  { %479 = vperm.xlu0 %790, %v1041_v18  }
 0x125   :  { %324 = vrot.lane.b32.xlu1 %v1024_v16, %s928_s21 }
 0x126   :  { %247 = vperm.xlu0 %790, %v1024_v16   ;;  %787 = vset.pattern.permute.xlu1 %v930_v15 }
 0x129   :  { %312 = vperm.xlu1 %787, %v1041_v18  }
 0x12a   :  { %791 = vset.pattern.permute.xlu0 %v930_v15 }
 0x12b   :  { %307 = vperm.xlu0 %791, %v1053_v19  }
 0x12d   :  { %789 = vset.pattern.permute.xlu1 %v929_v13 }
 0x12e   :  { %419 = vperm.xlu1 %789, %v1041_v18  }
 0x12f   :  { %792 = vset.pattern.permute.xlu0 %v929_v13 }
 0x130   :  { %415 = vperm.xlu0 %792, %v1053_v19  }
 0x132   :  { %219 = vperm.xlu1 %789, %v1024_v16  }
 0x136   :  { %793 = vset.pattern.permute.xlu1 %v933_v17 }
 0x137   :  { %475 = vperm.xlu1 %793, %v1053_v19  }
 0x13b   :  { %794 = vset.pattern.permute.xlu1 %v930_v15 }
 0x178   :  { %v609_v28 = vpop.permute.xlu1 %608  ;;  %v593_v30 = vpop.permute.xlu0 %592 }
 0x179   :  { %v600_v32 = vmul.f32 %v598_v25, %v593_v30  ;;  %v616_v34 = vmul.f32 %v614_v27, %v609_v28 }
 0x17b   :  { %v602_v35 = vadd.f32 %v736_v29, %v600_v32 }
 0x17d   :  { %v625_v37 = vpop.permute.xlu1 %624  ;;  %v618_v38 = vadd.f32 %v616_v34, %v602_v35  ;;  %v641_v39 = vpop.permute.xlu0 %640 }
 0x17e   :  { %v632_v40 = vmul.f32 %v630_v33, %v625_v37  ;;  %v648_v42 = vmul.f32 %v646_v36, %v641_v39 }
 0x180   :  { %v634_v41 = vadd.f32 %v632_v40, %v618_v38 }
 0x181   :  { %v327_v43 = vpop.permute.xlu1 %326 }
 0x182   :  { %v331_v44 = vmul.f32 %v327_v43, %v1012_v10  ;;  %v1080_v45 = vpop.permute.xlu0 %223  ;;  %v1082_v46 = vadd.f32 %v648_v42, %v634_v41 }
 0x183   :  { %v243_v62 = vmul.f32 %v241_v55, %v1080_v45 }
 0x184   :  { %339 = vperm.xlu1 %794, %v331_v44   ;;  %436 = vperm.xlu0 %792, %v331_v44  }
 0x185   :  { %v354_v47 = vpop.permute.xlu1 %353 }
 0x186   :  { %v358_v48 = vmul.f32 %v354_v47, %v1012_v10 }
 0x187   :  { %v589_v49 = vpop.permute.xlu0 %588 }
 0x188   :  { %366 = vperm.xlu1 %794, %v358_v48   ;;  %453 = vperm.xlu0 %792, %v358_v48   ;;  %v599_v6 = vmul.f32 %v598_v25, %v589_v49  ;;  %v722_v49 = vld [vmem:[#allocation8 + $0x1] ss:$0 sm:$0xff] }
 0x189   :  { %v381_v52 = vpop.permute.xlu1 %380 }
 0x18a   :  { %v385_v53 = vmul.f32 %v381_v52, %v1012_v10  ;;  %v601_v11 = vadd.f32 %v736_v29, %v599_v6 }
 0x18c   :  { %v621_v56 = vpop.permute.xlu0 %620  ;;  %393 = vperm.xlu1 %794, %v385_v53   ;;  %799 = vset.pattern.permute.xlu0 %v934_v58 }
 0x18d   :  { %v1092_v59 = vpop.permute.xlu1 %195  ;;  %v631_v24 = vmul.f32 %v630_v33, %v621_v56 }
 0x18e   :  { %v215_v60 = vmul.f32 %v213_v54, %v1092_v59 }
 0x190   :  { %v217_v63 = vadd.f32 %v215_v60, %v186_v57  ;;  %v352_v0 = vpop.permute.xlu0 %351  ;;  %795 = vset.pattern.permute.xlu1 %v933_v17  ;;  %v725_v60 = vld [vmem:[#allocation8 + $0x4] ss:$0 sm:$0xff] }
 0x191   :  { %496 = vperm.xlu1 %795, %v331_v44   ;;  %v357_v37 = vmul.f32 %v352_v0, %v1024_v16  ;;  %v655_v44 = vsel %vm651_vm1, %v1082_v46, 0.0  ;;  %v410_v0 = vmul.f32 %v725_v60, %v1092_v59 }
 0x192   :  { %v1098_v1 = vpop.permute.xlu1 %251  ;;  %v245_v3 = vadd.f32 %v243_v62, %v217_v63 }
 0x193   :  { %v271_v4 = vmul.f32 %v269_v61, %v1098_v1 }
 0x194   :  { %v379_v7 = vpop.permute.xlu0 %378 }
 0x195   :  { %796 = vset.pattern.permute.xlu1 %v930_v15  ;;  %v1102_v8 = vadd.f32 %v271_v4, %v245_v3  ;;  %v727_v4 = vld [vmem:[#allocation8 + $0x6] ss:$0 sm:$0xff] }
 0x197   :  { %v605_v9 = vpop.permute.xlu1 %604 }
 0x198   :  { %v615_v14 = vmul.f32 %v614_v27, %v605_v9  ;;  %v1104_v20 = vpop.permute.xlu0 %190  ;;  %v728_v9 = vld [vmem:[#allocation8 + $0x7] ss:$0 sm:$0xff] }
 0x199   :  { %v214_v22 = vmul.f32 %v213_v54, %v1104_v20  ;;  %v723_v54 = vld [vmem:[#allocation8 + $0x2] ss:$0 sm:$0xff] }
 0x19a   :  { %v617_v23 = vadd.f32 %v615_v14, %v601_v11 }
 0x19b   :  { %v216_v40 = vadd.f32 %v214_v22, %v186_v57  ;;  %v724_v57 = vld [vmem:[#allocation8 + $0x3] ss:$0 sm:$0xff] }
 0x19c   :  { %v637_v26 = vpop.permute.xlu1 %636  ;;  %v633_v32 = vadd.f32 %v631_v24, %v617_v23  ;;  %v729_v23 = vld [vmem:[#allocation8 + $0x8] ss:$0 sm:$0xff] }
 0x19d   :  { %v1107_v28 = vpop.permute.xlu0 %479  ;;  %v647_v30 = vmul.f32 %v646_v36, %v637_v26  ;;  %v384_v36 = vmul.f32 %v379_v7, %v1024_v16 }
 0x19f   :  { %v1113_v29 = vadd.f32 %v647_v30, %v633_v32  ;;  %v730_v30 = vld [vmem:[#allocation8 + $0x9] ss:$0 sm:$0xff]  ;;  %v470_v32 = vmul.f32 %v729_v23, %v1080_v45 }
 0x1a0   :  { %v325_v25 = vpop.permute.xlu1 %324 }
 0x1a1   :  { %v330_v34 = vmul.f32 %v325_v25, %v1024_v16  ;;  %v1110_v15 = vpop.permute.xlu0 %247  ;;  %v652_v33 = vsel %vm651_vm1, %v1113_v29, 0.0 }
 0x1a2   :  { %v270_v35 = vmul.f32 %v269_v61, %v1110_v15 }
 0x1a3   :  { %334 = vperm.xlu1 %796, %v330_v34  }
 0x1a4   :  { %v313_v27 = vpop.permute.xlu1 %312 }
 0x1a6   :  { %v308_v48 = vpop.permute.xlu0 %307 }
 0x1a7   :  { %361 = vperm.xlu1 %796, %v357_v37   ;;  %653 = vadd.xlane.f32.xlu0 %v652_v33  ;;  %v732_v33 = vld [vmem:[#allocation8 + $0xb] ss:$0 sm:$0xff] }
 0x1a9   :  { %v420_v38 = vpop.permute.xlu1 %419 }
 0x1ab   :  { %388 = vperm.xlu1 %796, %v384_v36  }
 0x1ad   :  { %v1119_v39 = vpop.permute.xlu1 %219 }
 0x1ae   :  { %v242_v41 = vmul.f32 %v241_v55, %v1119_v39  ;;  %v416_v55 = vpop.permute.xlu0 %415 }
 0x1af   :  { %797 = vset.pattern.permute.xlu1 %v929_v13  ;;  %v721_v13 = vld [vmem:[#allocation8] ss:$0 sm:$0xff] }
 0x1b0   :  { %v244_v42 = vadd.f32 %v242_v41, %v216_v40  ;;  %432 = vperm.xlu1 %797, %v330_v34   ;;  %v320_v52 = vmul.f32 %v721_v13, %v313_v27  ;;  %v487_v27 = vmul.f32 %v730_v30, %v1107_v28  ;;  %v513_v40 = vmul.f32 %v732_v33, %v1098_v1 }
 0x1b1   :  { %v409_v28 = vmul.f32 %v725_v60, %v1104_v20 }
 0x1b2   :  { %v1123_v43 = vadd.f32 %v270_v35, %v244_v42  ;;  %v1130_v47 = vpop.permute.xlu1 %475 }
 0x1b4   :  { %449 = vperm.xlu1 %797, %v357_v37  }
 0x1b8   :  { %798 = vset.pattern.permute.xlu1 %v933_v17 }
 0x1b9   :  { %492 = vperm.xlu1 %798, %v330_v34   ;;  %v731_v34 = vld [vmem:[#allocation8 + $0xa] ss:$0 sm:$0xff] }
 0x1bd   :  { %518 = vperm.xlu0 %799, %v1053_v19   ;;  %800 = vset.pattern.permute.xlu1 %v934_v58 }
 0x1dd   :  { %656 = vadd.xlane.f32.xlu1 %v655_v44 }
 0x1ee   :  { %522 = vperm.xlu1 %800, %v1041_v18   ;;  %v726_v18 = vld [vmem:[#allocation8 + $0x5] ss:$0 sm:$0xff] }
 0x1ef   :  { %v427_v6 = vmul.f32 %v726_v18, %v420_v38 }
 0x1ff   :  { %v340_v50 = vpop.permute.xlu1 %339  ;;  %v437_v61 = vpop.permute.xlu0 %436 }
 0x200   :  { %v347_v53 = vmul.f32 %v722_v49, %v340_v50  ;;  %v444_v14 = vmul.f32 %v727_v4, %v437_v61  ;;  %v319_v50 = vmul.f32 %v721_v13, %v308_v48  ;;  %v469_v48 = vmul.f32 %v729_v23, %v1119_v39 }
 0x202   :  { %v349_v17 = vadd.f32 %v347_v53, %v320_v52 }
 0x203   :  { %v367_v56 = vpop.permute.xlu1 %366  ;;  %v454_v11 = vpop.permute.xlu0 %453 }
 0x204   :  { %v374_v19 = vmul.f32 %v723_v54, %v367_v56  ;;  %v461_v24 = vmul.f32 %v728_v9, %v454_v11 }
 0x206   :  { %v376_v58 = vadd.f32 %v374_v19, %v349_v17 }
 0x207   :  { %v394_v62 = vpop.permute.xlu1 %393 }
 0x208   :  { %v401_v63 = vmul.f32 %v724_v57, %v394_v62 }
 0x20a   :  { %v403_v3 = vadd.f32 %v401_v63, %v376_v58  ;;  %v426_v63 = vmul.f32 %v726_v18, %v416_v55 }
 0x20c   :  { %v412_v7 = vadd.f32 %v410_v0, %v403_v3  ;;  %v497_v35 = vpop.permute.xlu1 %496 }
 0x20d   :  { %v504_v38 = vmul.f32 %v731_v34, %v497_v35 }
 0x20e   :  { %v429_v22 = vadd.f32 %v427_v6, %v412_v7 }
 0x210   :  { %v446_v26 = vadd.f32 %v444_v14, %v429_v22 }
 0x212   :  { %v463_v25 = vadd.f32 %v461_v24, %v446_v26 }
 0x214   :  { %v472_v37 = vadd.f32 %v470_v32, %v463_v25 }
 0x216   :  { %v489_v36 = vadd.f32 %v487_v27, %v472_v37  ;;  %v199_v37 = vmul.f32 %v1092_v59, %v1012_v10  ;;  %v86_v59 = vsel %vm82_vm0, %v1005_v5, 0.0  ;;  %v297_v5 = vrot.slane %v1086_v51, %v296_v31 }
 0x218   :  { %v506_v41 = vadd.f32 %v504_v38, %v489_v36  ;;  %v733_v38 = vld [vmem:[#allocation8 + $0xc] ss:$0 sm:$0xff] }
 0x21a   :  { %v1136_v42 = vadd.f32 %v513_v40, %v506_v41  ;;  %v734_v41 = vld [vmem:[#allocation8 + $0xd] ss:$0 sm:$0xff] }
 0x21e   :  { %v335_v44 = vpop.permute.xlu1 %334 }
 0x21f   :  { %v346_v52 = vmul.f32 %v722_v49, %v335_v44 }
 0x221   :  { %v348_v53 = vadd.f32 %v346_v52, %v319_v50 }
 0x222   :  { %v362_v17 = vpop.permute.xlu1 %361 }
 0x223   :  { %v373_v56 = vmul.f32 %v723_v54, %v362_v17 }
 0x225   :  { %v375_v19 = vadd.f32 %v373_v56, %v348_v53  ;;  %v735_v53 = vld [vmem:[#allocation8 + $0xe] ss:$0 sm:$0xff] }
 0x226   :  { %v389_v58 = vpop.permute.xlu1 %388 }
 0x227   :  { %v400_v61 = vmul.f32 %v724_v57, %v389_v58  ;;  %v486_v57 = vmul.f32 %v730_v30, %v1130_v47  ;;  %v83_v30 = vsel %vm82_vm0, %v1001_v2, 0.0  ;;  %v254_v2 = vmul.f32 %v1110_v15, %v1024_v16 }
 0x229   :  { %v402_v62 = vadd.f32 %v400_v61, %v375_v19 }
 0x22b   :  { %v411_v0 = vadd.f32 %v409_v28, %v402_v62  ;;  %v433_v3 = vpop.permute.xlu1 %432 }
 0x22c   :  { %v443_v6 = vmul.f32 %v727_v4, %v433_v3 }
 0x22d   :  { %v428_v7 = vadd.f32 %v426_v63, %v411_v0 }
 0x22f   :  { %v445_v11 = vadd.f32 %v443_v6, %v428_v7  ;;  %v450_v14 = vpop.permute.xlu1 %449 }
 0x230   :  { %v460_v22 = vmul.f32 %v728_v9, %v450_v14  ;;  %v654_v24 = vpop.xlane.xlu0 %653  ;;  %v512_v9 = vmul.f32 %v732_v33, %v1110_v15  ;;  %v198_v33 = vmul.f32 %v1104_v20, %v1024_v16  ;;  %v255_v15 = vmul.f32 %v1098_v1, %v1012_v10 }
 0x231   :  { %v659_v13 = vmul.f32 0.0625, %v654_v24 }
 0x232   :  { %v462_v49 = vadd.f32 %v460_v22, %v445_v11 }
 0x233   :  { %v1141_v54 = vsub.f32 %v1113_v29, %v659_v13 }
 0x234   :  { %v471_v60 = vadd.f32 %v469_v48, %v462_v49  ;;  %v493_v26 = vpop.permute.xlu1 %492 }
 0x235   :  { %v503_v55 = vmul.f32 %v731_v34, %v493_v26  ;;  %v663_v18 = vmul.f32 %v1141_v54, %v1141_v54 }
 0x236   :  { %v488_v4 = vadd.f32 %v486_v57, %v471_v60 }
 0x237   :  { %v665_v32 = vsel %vm651_vm1, %v663_v18, 0.0 }
 0x238   :  { %v505_v25 = vadd.f32 %v503_v55, %v488_v4  ;;  %666 = vadd.xlane.f32.xlu1 %v665_v32  ;;  %v519_v21 = vpop.permute.xlu0 %518 }
 0x239   :  { %v529_v31 = vmul.f32 %v733_v38, %v519_v21 }
 0x23a   :  { %v514_v23 = vadd.f32 %v512_v9, %v505_v25 }
 0x23c   :  { %v531_v28 = vadd.f32 %v529_v31, %v514_v23 }
 0x249   :  { %279 = vperm.xlu1 %800, %v1012_v10  }
 0x266   :  { %v657_v29 = vpop.xlane.xlu1 %656 }
 0x267   :  { %v660_v35 = vmul.f32 0.0625, %v657_v29 }
 0x269   :  { %v1150_v47 = vsub.f32 %v1082_v46, %v660_v35  ;;  %v226_v46 = vmul.f32 %v1119_v39, %v1024_v16  ;;  %v227_v39 = vmul.f32 %v1080_v45, %v1012_v10 }
 0x26a   :  { %v523_v36 = vpop.permute.xlu1 %522 }
 0x26b   :  { %v664_v34 = vmul.f32 %v1150_v47, %v1150_v47  ;;  %v530_v40 = vmul.f32 %v733_v38, %v523_v36 }
 0x26d   :  { %84 = vadd.xlane.f32.xlu1 %v83_v30  ;;  %v668_v27 = vsel %vm651_vm1, %v664_v34, 0.0  ;;  %v532_v44 = vadd.f32 %v530_v40, %v1136_v42 }
 0x26e   :  { %669 = vadd.xlane.f32.xlu0 %v668_v27 }
 0x27e   :  { %204 = vrot.lane.b32.xlu1 %v199_v37, %s935_s5 }
 0x282   :  { %230 = vrot.lane.b32.xlu1 %v226_v46, %s936_s6 }
 0x284   :  { %275 = vperm.xlu0 %799, %v1024_v16  }
 0x286   :  { %258 = vrot.lane.b32.xlu1 %v254_v2, %s937_s27 }
 0x288   :  { %801 = vset.pattern.permute.xlu0 %v927_v12 }
 0x2a3   :  { %87 = vadd.xlane.f32.xlu0 %v86_v59 }
 0x2b9   :  { %202 = vrot.lane.b32.xlu0 %v198_v33, %s935_s5 }
 0x2bd   :  { %232 = vrot.lane.b32.xlu0 %v227_v39, %s936_s6 }
 0x2c1   :  { %260 = vrot.lane.b32.xlu0 %v255_v15, %s937_s27  ;;  %v667_v12 = vpop.xlane.xlu1 %666 }
 0x2c2   :  { %v671_v0 = vmul.f32 0.0625, %v667_v12 }
 0x2c4   :  { %v673_v22 = vadd.f32 1e-05, %v671_v0 }
 0x2c5   :  { %v280_v20 = vpop.permute.xlu1 %279 }
 0x2c6   :  { %v283_v50 = vmul.f32 %v280_v20, %v1012_v10  ;;  %v299_v45 = vmul.f32 %v297_v5, %v280_v20  ;;  %v539_v52 = vmul.f32 %v734_v41, %v280_v20  ;;  %802 = vrsqrt.f32 %v673_v22 }
 0x2c8   :  { %v541_v17 = vadd.f32 %v539_v52, %v532_v44  ;;  %288 = vrot.lane.b32.xlu0 %v283_v50, %s938_s28  ;;  %v301_v1 = vadd.f32 %v299_v45, %v1102_v8 }
 0x2ca   :  { %v548_v56 = vadd.f32 %v735_v53, %v541_v17  ;;  %v550_v19 = vmul.f32 %v301_v1, %v301_v1 }
 0x2cc   :  { %v552_v58 = vsub.f32 %v548_v56, %v550_v19 }
 0x2ce   :  { %v566_v60 = vadd.f32 1e-05, %v552_v58 }
 0x2d3   :  { %v803_v48 = vpop.eup %802 }
 0x2d4   :  { %v677_v57 = vmul.f32 %v803_v48, %v1141_v54 }
 0x2f6   :  { %v85_v7 = vpop.xlane.xlu1 %84 }
 0x2f7   :  { %v670_v61 = vpop.xlane.xlu0 %669 }
 0x2fa   :  { %v205_v54 = vpop.permute.xlu1 %204 }
 0x2fb   :  { %v209_v12 = vadd.f32 %v205_v54, %v1012_v10 }
 0x2fe   :  { %v231_v25 = vpop.permute.xlu1 %230 }
 0x2ff   :  { %v276_v51 = vpop.permute.xlu0 %275 }
 0x300   :  { %v282_v42 = vmul.f32 %v276_v51, %v1024_v16  ;;  %v298_v62 = vmul.f32 %v297_v5, %v276_v51  ;;  %v538_v63 = vmul.f32 %v734_v41, %v276_v51 }
 0x302   :  { %v300_v3 = vadd.f32 %v298_v62, %v1123_v43  ;;  %v540_v6 = vadd.f32 %v538_v63, %v531_v28  ;;  %286 = vrot.lane.b32.xlu1 %v282_v42, %s938_s28  ;;  %v672_v43 = vmul.f32 0.0625, %v670_v61  ;;  %v259_v23 = vpop.permute.xlu1 %258 }
 0x304   :  { %v547_v11 = vadd.f32 %v735_v53, %v540_v6  ;;  %v549_v8 = vmul.f32 %v300_v3, %v300_v3  ;;  %v553_v14 = vmul.f32 %v300_v3, %v85_v7  ;;  %v674_v26 = vadd.f32 1e-05, %v672_v43 }
 0x306   :  { %v551_v24 = vsub.f32 %v547_v11, %v549_v8  ;;  %557 = vrot.lane.b32.xlu1 %v553_v14, %s935_s5 }
 0x308   :  { %v565_v13 = vadd.f32 1e-05, %v551_v24 }
 0x30a   :  { %804 = vrsqrt.f32 %v565_v13 }
 0x30b   :  { %806 = vrsqrt.f32 %v566_v60 }
 0x30c   :  { %808 = vrsqrt.f32 %v674_v26 }
 0x317   :  { %v805_v49 = vpop.eup %804 }
 0x318   :  { %571 = vrot.lane.b32.xlu1 %v805_v49, %s935_s5  ;;  %v807_v4 = vpop.eup %806 }
 0x319   :  { %v809_v32 = vpop.eup %808 }
 0x31a   :  { %v678_v9 = vmul.f32 %v809_v32, %v1150_v47 }
 0x31c   :  { %681 = vrot.lane.b32.xlu1 %v677_v57, %s935_s5 }
 0x32c   :  { %v88_v55 = vpop.xlane.xlu0 %87 }
 0x32d   :  { %v554_v18 = vmul.f32 %v301_v1, %v88_v55 }
 0x32f   :  { %559 = vrot.lane.b32.xlu0 %v554_v18, %s935_s5 }
 0x330   :  { %v203_v29 = vpop.permute.xlu0 %202 }
 0x331   :  { %v208_v35 = vadd.f32 %v203_v29, %v1024_v16 }
 0x333   :  { %573 = vrot.lane.b32.xlu0 %v807_v4, %s935_s5  ;;  %v236_v34 = vadd.f32 %v231_v25, %v208_v35 }
 0x334   :  { %v233_v15 = vpop.permute.xlu0 %232 }
 0x335   :  { %v264_v37 = vadd.f32 %v259_v23, %v236_v34  ;;  %v237_v40 = vadd.f32 %v233_v15, %v209_v12 }
 0x337   :  { %683 = vrot.lane.b32.xlu0 %v678_v9, %s935_s5 }
 0x338   :  { %v261_v47 = vpop.permute.xlu0 %260 }
 0x339   :  { %v265_v16 = vadd.f32 %v261_v47, %v237_v40 }
 0x33c   :  { %v289_v38 = vpop.permute.xlu0 %288 }
 0x33d   :  { %v293_v41 = vadd.f32 %v289_v38, %v265_v16 }
 0x374   :  { %v287_v30 = vpop.permute.xlu1 %286 }
 0x375   :  { %v292_v46 = vadd.f32 %v287_v30, %v264_v37 }
 0x378   :  { %v558_v27 = vpop.permute.xlu1 %557 }
 0x379   :  { %v563_v59 = vsub.f32 %v292_v46, %v558_v27 }
 0x38a   :  { %v572_v2 = vpop.permute.xlu1 %571 }
 0x38b   :  { %v577_v33 = vmul.f32 %v572_v2, %v563_v59 }
 0x38e   :  { %v682_v39 = vpop.permute.xlu1 %681 }
 0x38f   :  { %v687_v36 = vadd.f32 %v682_v39, %v577_v33 }
 0x391   :  { %691 = vrot.lane.b32.xlu1 %v687_v36, %s935_s5 }
 0x3a1   :  { %v560_v5 = vpop.permute.xlu0 %559 }
 0x3a2   :  { %v564_v44 = vsub.f32 %v293_v41, %v560_v5 }
 0x3a5   :  { %v574_v20 = vpop.permute.xlu0 %573 }
 0x3a6   :  { %v578_v50 = vmul.f32 %v574_v20, %v564_v44 }
 0x3a9   :  { %v684_v45 = vpop.permute.xlu0 %683 }
 0x3aa   :  { %v688_v52 = vadd.f32 %v684_v45, %v578_v50 }
 0x3ac   :  { %693 = vrot.lane.b32.xlu0 %v688_v52, %s935_s5 }
 0x403   :  { %v692_v53 = vpop.permute.xlu1 %691 }
 0x404   :  { %697 = vst.msk [vmem:[#allocation10] sm:$0xff] %vm651_vm1, %v692_v53 }
 0x41e   :  { %v694_v17 = vpop.permute.xlu0 %693 }
 0x41f   :  { %698 = vst.msk [vmem:[#allocation10 + $0x8] sm:$0xff] %vm651_vm1, %v694_v17 }
 0x420   :  { %901 = shalt.err (!%p898_p10)
}
 0x421   :  { %710 = dma.vmem_to_hbm [thread:$0]  %s705_s9, 256, %s1210_s7, [#allocation4], %s920_s29, %s920_s29, %s921_s30  }
 0x422   :  { %916 = dma.done.wait [#allocation4], 256  }
 0x423   :  { %917 = vsyncadd [#allocation4], 4294967040 }
 0x424   :  { %714 = vsyncpa [#allocation3], 1 }
 0x425   :  { %715 = vsyncpa [#allocation6], 1 }
 0x426   :  { %716 = vsyncpa [#allocation9], 1 }
 0x427   :  { %717 = vsyncpa [#allocation4], 1 }

</bundles_post_ra>
